<compile_context>
chip_gen: v7x
topology: tpu7x:2x2x1
jax: 0.10.0
libtpu: 0.0.40
codegen_flags: <defaults>
</compile_context>

<pallas_src>
import functools

import jax
import jax.numpy as jnp
from jax.experimental import pallas as pl
from jax.experimental.pallas import tpu as pltpu


def _round_up(n, m):
    return ((n + m - 1) // m) * m


def _vmem_limit_bytes():
    # Generation-aware cap: v7x has 64 MiB VMEM per TensorCore, v5e/v6e 128 MiB.
    # Leave ~30% headroom for Mosaic internal scratch / resident W, b.
    try:
        cap = int(pltpu.get_tpu_info().vmem_capacity_bytes)
    except Exception:
        cap = 64 << 20  # conservative fallback (v7x-sized)
    return int(min(cap * 7 // 10, 100 << 20))


def _choose_batch_tile(B, D, vmem_limit):
    """Largest batch tile whose double-buffered, lane-padded blocks fit VMEM."""
    d_pad = _round_up(D, 128)
    # Per row of TB: 2 buffers * 4 B * (x tile lanes + companion block lanes).
    # The companion (softmax output or int32 labels) pads to 128 lanes.
    bytes_per_row = 2 * 4 * (d_pad + 128)
    budget = max(vmem_limit - (6 << 20), 2 << 20)
    tb = budget // bytes_per_row
    tb = min(tb, 16384)            # plenty to amortize the ~0.35 us/step overhead
    if tb >= B:
        return B                   # single block; block dim == full dim is legal
    return max(8, (tb // 8) * 8)   # f32 sublane alignment


def _linear_softmax_kernel(x_ref, w_ref, b_ref, o_ref):
    # MXU matmul, f32 accumulate; softmax normalize via EUP reciprocal.
    z = jnp.dot(x_ref[...], w_ref[...], preferred_element_type=jnp.float32)
    z = z + b_ref[...]                                   # (1, C) broadcast over (TB, C)
    m = jnp.max(z, axis=1, keepdims=True)
    e = jnp.exp(z - m)
    denom = jnp.sum(e, axis=1, keepdims=True)
    o_ref[...] = (e * pl.reciprocal(denom, approx=True)).astype(o_ref.dtype)


def _linear_softmax_ce_kernel(x_ref, w_ref, b_ref, y_ref, loss_ref, *,
                              batch, tile_b, out_dim, tiles_per_core):
    t = pl.program_id(1)

    @pl.when(t == 0)
    def _init():
        loss_ref[...] = jnp.zeros_like(loss_ref)

    # Intended (unclamped) tile index; overhang tiles (i >= num_tiles) are fully
    # masked below even though their DMA was clamped to the last real tile.
    i = pl.program_id(0) * tiles_per_core + t

    # Linear + softmax (exact division on the training path).
    z = jnp.dot(x_ref[...], w_ref[...], preferred_element_type=jnp.float32)
    z = z + b_ref[...]
    m = jnp.max(z, axis=1, keepdims=True)
    e = jnp.exp(z - m)
    p = e / jnp.sum(e, axis=1, keepdims=True)            # probabilities (TB, C)

    # nn.CrossEntropyLoss applied to the (already softmaxed) probabilities,
    # faithfully replicating the PyTorch module (intentional double softmax).
    m2 = jnp.max(p, axis=1, keepdims=True)
    lse = m2 + jnp.log(jnp.sum(jnp.exp(p - m2), axis=1, keepdims=True))
    logp = p - lse                                       # (TB, C)

    # One-hot mask (VPU select + reduce) instead of a gather.
    cls = jax.lax.broadcasted_iota(jnp.int32, (tile_b, out_dim), 1)
    onehot = (cls == y_ref[...]).astype(jnp.float32)     # y_ref: (TB, 1) int32
    per_row = -jnp.sum(logp * onehot, axis=1, keepdims=True)   # (TB, 1)

    # Mask rows beyond the real batch (partial last tile + clamped overhang tiles).
    row = jax.lax.broadcasted_iota(jnp.int32, (tile_b, 1), 0) + i * tile_b
    per_row = jnp.where(row < batch, per_row, 0.0)

    contrib = jnp.sum(per_row, axis=0, keepdims=True) * (1.0 / batch)   # (1, 1)
    loss_ref[0:1, 0:1] = loss_ref[0:1, 0:1] + contrib


def torch_model_forward(x, w, b, y=None):
    """Equivalent of TorchModel.forward.

    x: (B, input_size) float32
    w: (input_size, 5) float32   (transposed PyTorch weight)
    b: (1, 5) float32
    y: optional (B,) int class labels -> scalar cross-entropy loss
    """
    B, D = x.shape
    C = w.shape[1]
    w = w.astype(jnp.float32)
    b = b.astype(jnp.float32).reshape(1, C)

    vmem_limit = _vmem_limit_bytes()
    TB = _choose_batch_tile(B, D, vmem_limit)
    num_tiles = pl.cdiv(B, TB)

    cost = pl.CostEstimate(
        flops=2 * B * D * C,
        transcendentals=2 * B * C,
        bytes_accessed=(B * D * 4            # x (f32, single HBM read)
                        + D * C * 4          # w (resident)
                        + C * 4              # b (resident)
                        + B * C * 4          # output probs (inference path)
                        + (B * 4 if y is not None else 0)),
    )

    w_spec = pl.BlockSpec((D, C), lambda *_: (0, 0))     # VMEM-resident
    b_spec = pl.BlockSpec((1, C), lambda *_: (0, 0))     # VMEM-resident

    if y is None:
        # Inference: batch tiles fully independent -> "parallel" (2 TCs on v7x).
        return pl.pallas_call(
            _linear_softmax_kernel,
            out_shape=jax.ShapeDtypeStruct((B, C), jnp.float32),
            grid=(num_tiles,),
            in_specs=[pl.BlockSpec((TB, D), lambda i: (i, 0)),
                      w_spec, b_spec],
            out_specs=pl.BlockSpec((TB, C), lambda i: (i, 0)),
            compiler_params=pltpu.CompilerParams(
                dimension_semantics=("parallel",),
                vmem_limit_bytes=vmem_limit,
            ),
            cost_estimate=cost,
        )(x, w, b)

    # Training: fused cross-entropy. Leading 2-wide "parallel" axis gives each
    # TensorCore its own resident (8, 128) partial-loss block; the batch-tile
    # axis stays "arbitrary" within a core. Partials are summed in the wrapper.
    n_cores = 2 if num_tiles >= 2 else 1
    tiles_per_core = pl.cdiv(num_tiles, n_cores)
    last_tile = num_tiles - 1

    def data_idx(c, t):
        # Clamp overhang steps onto the last real tile; the kernel masks them.
        return (jnp.minimum(c * tiles_per_core + t, last_tile), 0)

    y2 = y.astype(jnp.int32).reshape(B, 1)
    kernel = functools.partial(_linear_softmax_ce_kernel,
                               batch=B, tile_b=TB, out_dim=C,
                               tiles_per_core=tiles_per_core)
    loss_parts = pl.pallas_call(
        kernel,
        out_shape=jax.ShapeDtypeStruct((n_cores * 8, 128), jnp.float32),
        grid=(n_cores, tiles_per_core),
        in_specs=[pl.BlockSpec((TB, D), data_idx),
                  w_spec, b_spec,
                  pl.BlockSpec((TB, 1), data_idx)],
        out_specs=pl.BlockSpec((8, 128), lambda c, t: (c, 0)),
        compiler_params=pltpu.CompilerParams(
            dimension_semantics=("parallel", "arbitrary"),
            vmem_limit_bytes=vmem_limit,
        ),
        cost_estimate=cost,
    )(x, w, b, y2)
    # Only element [0, 0] of each core's slab is nonzero; sum gives the mean loss.
    return jnp.sum(loss_parts)


if __name__ == "__main__":
    batch = 12          # not a multiple of 8 -> exercises the partial last block
    input_size = 32
    out_dim = 5

    key = jax.random.PRNGKey(0)
    kx, kw, kb, ky = jax.random.split(key, 4)

    # Deterministic parameter init mimicking nn.Linear (uniform +-1/sqrt(in_features)).
    bound = 1.0 / jnp.sqrt(jnp.float32(input_size))
    w = jax.random.uniform(kw, (input_size, out_dim), jnp.float32, -bound, bound)
    b = jax.random.uniform(kb, (1, out_dim), jnp.float32, -bound, bound)

    x = jax.random.normal(kx, (batch, input_size), jnp.float32)
    y = jax.random.randint(ky, (batch,), 0, out_dim, jnp.int32)

    # Inference path (y=None): softmax probabilities.
    y_pred = torch_model_forward(x, w, b)
    y_pred = jax.block_until_ready(y_pred)

    ref = jax.nn.softmax(x @ w + b, axis=1)
    assert y_pred.shape == (batch, out_dim)
    assert jnp.allclose(y_pred, ref, atol=1e-2), "mismatch vs softmax reference"
    assert jnp.allclose(jnp.sum(y_pred, axis=1), 1.0, atol=1e-2)

    # Training path (y given): scalar cross-entropy loss (double softmax, as in
    # the original PyTorch module).
    loss = torch_model_forward(x, w, b, y)
    loss = jax.block_until_ready(loss)
    logp_ref = ref - jax.scipy.special.logsumexp(ref, axis=1, keepdims=True)
    loss_ref = -jnp.mean(jnp.take_along_axis(logp_ref, y[:, None], axis=1))
    assert loss.shape == ()
    assert jnp.allclose(loss, loss_ref, atol=1e-2), "mismatch vs CE reference"

    print("KERNEL_OK")
</pallas_src>

<mosaic_0001>
module attributes {stable_mosaic.version = 11 : i64} {
  func.func @_linear_softmax_kernel(%arg0: i32, %arg1: memref<12x32xf32, #tpu.memory_space<vmem>>, %arg2: memref<32x5xf32, #tpu.memory_space<vmem>>, %arg3: memref<1x5xf32, #tpu.memory_space<vmem>>, %arg4: memref<12x5xf32, #tpu.memory_space<vmem>>) attributes {dimension_semantics = [#tpu.dimension_semantics<parallel>], iteration_bounds = array<i64: 1>, scalar_prefetch = 0 : i64, scratch_operands = 0 : i64, tpu.core_type = #tpu.core_type<tc>, window_params = [{transform_indices = @transform_0, window_bounds = array<i64: 12, 32>}, {pipeline_mode = #tpu.pipeline_mode<synchronous>, transform_indices = @transform_1, window_bounds = array<i64: 32, 5>}, {pipeline_mode = #tpu.pipeline_mode<synchronous>, transform_indices = @transform_2, window_bounds = array<i64: 1, 5>}, {transform_indices = @transform_3, window_bounds = array<i64: 12, 5>}]} {
    %c0 = arith.constant 0 : index
    %c0_0 = arith.constant 0 : index
    %0 = vector.load %arg1[%c0, %c0_0] : memref<12x32xf32, #tpu.memory_space<vmem>>, vector<12x32xf32>
    %c0_1 = arith.constant 0 : index
    %c0_2 = arith.constant 0 : index
    %1 = vector.load %arg2[%c0_1, %c0_2] : memref<32x5xf32, #tpu.memory_space<vmem>>, vector<32x5xf32>
    %cst = arith.constant dense<0.000000e+00> : vector<12x5xf32>
    %2 = tpu.matmul %0, %1, %cst {dimension_numbers = #tpu.dot_dimension_numbers<[1], [0], [0], [1], [0, 0, 1, 1], [], []>} : vector<12x32xf32>, vector<32x5xf32>, vector<12x5xf32> -> vector<12x5xf32>
    %c0_3 = arith.constant 0 : index
    %c0_4 = arith.constant 0 : index
    %3 = vector.load %arg3[%c0_3, %c0_4] : memref<1x5xf32, #tpu.memory_space<vmem>>, vector<1x5xf32>
    %4 = vector.broadcast %3 : vector<1x5xf32> to vector<12x5xf32>
    %5 = arith.addf %2, %4 : vector<12x5xf32>
    %cst_5 = arith.constant dense<0xFF800000> : vector<12xf32>
    %6 = vector.multi_reduction <maximumf>, %5, %cst_5 [1] : vector<12x5xf32> to vector<12xf32>
    %7 = vector.shape_cast %6 : vector<12xf32> to vector<12x1xf32>
    %8 = vector.broadcast %7 : vector<12x1xf32> to vector<12x5xf32>
    %9 = arith.subf %5, %8 : vector<12x5xf32>
    %10 = math.exp %9 : vector<12x5xf32>
    %cst_6 = arith.constant dense<0.000000e+00> : vector<12xf32>
    %11 = vector.multi_reduction <add>, %10, %cst_6 [1] : vector<12x5xf32> to vector<12xf32>
    %12 = vector.shape_cast %11 : vector<12xf32> to vector<12x1xf32>
    %13 = tpu.reciprocal %12 {approx = true} : vector<12x1xf32> -> vector<12x1xf32>
    %14 = vector.broadcast %13 : vector<12x1xf32> to vector<12x5xf32>
    %15 = arith.mulf %10, %14 : vector<12x5xf32>
    %c0_7 = arith.constant 0 : index
    %c0_8 = arith.constant 0 : index
    %16 = vector.load %arg4[%c0_7, %c0_8] : memref<12x5xf32, #tpu.memory_space<vmem>>, vector<12x5xf32>
    tpu.vector_store %arg4[%c0_7, %c0_8], %15 {strides = array<i32>} : memref<12x5xf32, #tpu.memory_space<vmem>>, vector<12x5xf32>,
    return
  }
  func.func @transform_0(%arg0: i32) -> (i32, i32) {
    %c0_i32 = arith.constant 0 : i32
    %c0_i32_0 = arith.constant 0 : i32
    return %arg0, %c0_i32 : i32, i32
  }
  func.func @transform_1(%arg0: i32) -> (i32, i32) {
    %c0_i32 = arith.constant 0 : i32
    %c0_i32_0 = arith.constant 0 : i32
    %c0_i32_1 = arith.constant 0 : i32
    return %c0_i32, %c0_i32_0 : i32, i32
  }
  func.func @transform_2(%arg0: i32) -> (i32, i32) {
    %c0_i32 = arith.constant 0 : i32
    %c0_i32_0 = arith.constant 0 : i32
    %c0_i32_1 = arith.constant 0 : i32
    return %c0_i32, %c0_i32_0 : i32, i32
  }
  func.func @transform_3(%arg0: i32) -> (i32, i32) {
    %c0_i32 = arith.constant 0 : i32
    %c0_i32_0 = arith.constant 0 : i32
    return %arg0, %c0_i32 : i32, i32
  }
}

</mosaic_0001>

<bundles_post_ra>
// kernel: tpu_custom_call.1
= control target key start
LH: loop header
LB: loop body
LE: loop exit
PB: predicated region body
PF: predicated region fallthrough
CT: control target
= control target key end

     0   :  { %vm27_vm0 = vcmask 261120   ;;  %vm109_vm1 = vcmask 39936   ;;  %vm113_vm2 = vcmask 35840   ;;  %s228_s1 = inlined_call_operand.vmem [shape: f32[32,5], index: 1, kind: input, shape index: {}]   ;;  %s229_s0 = inlined_call_operand.vmem [shape: f32[12,32], index: 0, kind: input, shape index: {}]   ;;  %s230_s2 = inlined_call_operand.vmem [shape: f32[1,5], index: 2, kind: input, shape index: {}]   ;;  %s231_s3 = inlined_call_operand.vmem [shape: f32[12,5], index: 3, kind: output, shape index: {}]  }
   0x1   :  { %v16_v0 = vld [vmem:[%s228_s1] sm:$0xff]  ;;  %v17_v1 = vld [vmem:[%s228_s1 + $0x8] sm:$0xff]  ;;  %v18_v2 = vld [vmem:[%s228_s1 + $0x10] sm:$0xff] }
   0x2   :  { %v159_v3 = vpack.c.bf16 %v17_v1, %v16_v0  ;;  %v19_v4 = vld [vmem:[%s228_s1 + $0x18] sm:$0xff]  ;;  %v14_v5 = vld [vmem:[%s229_s0] sm:$0xff]  ;;  %v15_v7 = vld [vmem:[%s229_s0 + $0x8] sm:$0xf] }
   0x3   :  { %v163_v6 = vpack.c.bf16 %v19_v4, %v18_v2  ;;  %156 = vmatprep.mubr.msk.f32.mxu0 %vm27_vm0, %v14_v5  ;;  %v139_v8 = vld [vmem:[%s230_s2] ss:$0 sm:$0xff] }
   0x4   :  { %160 = vmatprep.subr.bf16.mxu0 %v159_v3 }
   0x5   :  { %162 = vmatpush3.bf16.msra.mxu0 %v159_v3 }
   0x6   :  { %164 = vmatprep.subr.bf16.mxu0 %v163_v6 }
   0x9   :  { %166 = vmatpush3.bf16.msra.mxu0 %v163_v6 }
   0xc   :  { %157 = vmatmul.mubr.msk.f32.vlgmr.msra.gmra.mrb[0].mxu0 %vm27_vm0, %v15_v7 }
  0xdf   :  { %v158_v9 = vpop.f32.mrb[0].mxu0 }
  0xe0   :  { %v100_v10 = vpop.f32.mrb[1].mxu0  ;;  %v106_v12 = vadd.f32 %v158_v9, %v139_v8 }
  0xe1   :  { %v101_v11 = vadd.f32 %v139_v8, %v100_v10 }
  0xe2   :  { %v114_v14 = vsel %vm113_vm2, %v106_v12, -inf }
  0xe3   :  { %v110_v13 = vsel %vm109_vm1, %v101_v11, -inf }
  0xe4   :  { %111 = vmax.xlane.f32.xlu0 %v110_v13 }
  0xe8   :  { %115 = vmax.xlane.f32.xlu0 %v114_v14 }
 0x171   :  { %v112_v15 = vpop.xlane.xlu0 %111 }
 0x172   :  { %v117_v16 = vsub.f32 %v101_v11, %v112_v15 }
 0x174   :  { %v119_v17 = vmul.f32 1.442695, %v117_v16 }
 0x175   :  { %v116_v18 = vpop.xlane.xlu0 %115 }
 0x176   :  { %167 = vpow2.f32 %v119_v17  ;;  %v118_v19 = vsub.f32 %v106_v12, %v116_v18 }
 0x178   :  { %v121_v20 = vmul.f32 1.442695, %v118_v19 }
 0x17a   :  { %169 = vpow2.f32 %v121_v20 }
 0x180   :  { %v168_v21 = vpop.eup %167 }
 0x181   :  { %v123_v22 = vsel %vm109_vm1, %v168_v21, 0.0 }
 0x182   :  { %124 = vadd.xlane.f32.xlu1 %v123_v22 }
 0x184   :  { %v170_v23 = vpop.eup %169 }
 0x185   :  { %v126_v24 = vsel %vm113_vm2, %v170_v23, 0.0 }
 0x186   :  { %127 = vadd.xlane.f32.xlu1 %v126_v24 }
 0x20f   :  { %v125_v25 = vpop.xlane.xlu1 %124 }
 0x210   :  { %171 = vrcp.f32 %v125_v25 }
 0x213   :  { %v128_v26 = vpop.xlane.xlu1 %127 }
 0x214   :  { %173 = vrcp.f32 %v128_v26 }
 0x21a   :  { %v172_v27 = vpop.eup %171 }
 0x21b   :  { %v131_v28 = vmul.f32 %v172_v27, %v168_v21 }
 0x21d   :  { %133 = vst.msk [vmem:[%s231_s3] sm:$0xff] %vm109_vm1, %v131_v28 }
 0x21e   :  { %v174_v29 = vpop.eup %173 }
 0x21f   :  { %v132_v30 = vmul.f32 %v174_v29, %v170_v23 }
 0x221   :  { %134 = vst.msk [vmem:[%s231_s3 + $0x8] sm:$0xf] %vm113_vm2, %v132_v30 }

</bundles_post_ra>
